<compile_context>
chip_gen: v5e
topology: v5e:2x2
jax: 0.10.0
libtpu: 0.0.40
codegen_flags: <defaults>
</compile_context>

<pallas_src>
import functools

import jax
import jax.numpy as jnp
from jax.experimental import pallas as pl
from jax.experimental.pallas import tpu as pltpu


def _series_decomp_kernel(x_ref, res_ref, mean_ref, pad_ref, *, kernel_size, pad):
    """x_ref: (Bt, L, C) tile; pad_ref: (Bt, L + 2*pad, C) f32 scratch."""
    inv_k = jnp.float32(1.0 / kernel_size)
    xf = x_ref[...].astype(jnp.float32)                       # (Bt, L, C)
    bt, L, C = xf.shape

    if pad > 0:
        # Build the edge-replicated padded sequence in VMEM scratch.
        pad_ref[:, pad:pad + L, :] = xf
        pad_ref[:, 0:pad, :] = jnp.broadcast_to(xf[:, 0:1, :], (bt, pad, C))
        pad_ref[:, pad + L:pad + L + pad, :] = jnp.broadcast_to(
            xf[:, L - 1:L, :], (bt, pad, C))

        # Sliding-window sum: kernel_size static shifted slices, unrolled at
        # trace time. Pure VPU adds (no MXU, no cross-lane work) — this stays
        # hidden under the HBM DMA for any realistic kernel_size.
        acc = pad_ref[:, 0:L, :]
        for j in range(1, kernel_size):
            acc = acc + pad_ref[:, j:j + L, :]
        mean = acc * inv_k
    else:
        # kernel_size == 1: moving average is the identity.
        mean = xf

    mean_ref[...] = mean.astype(mean_ref.dtype)
    res_ref[...] = (xf - mean).astype(res_ref.dtype)


def series_decomp(x, kernel_size, *, vmem_budget_bytes=16 * 1024 * 1024):
    """x: [B, L, C] -> (res, moving_mean), both [B, L, C], same dtype as x."""
    if kernel_size < 1 or kernel_size % 2 != 1:
        # The PyTorch module only shape-checks for odd kernel_size (even k would
        # produce L-1 outputs and fail the `x - moving_mean` broadcast).
        raise ValueError("series_decomp requires a positive odd kernel_size")
    B, L, C = x.shape
    pad = (kernel_size - 1) // 2
    item = jnp.dtype(x.dtype).itemsize

    # Per-batch-row resident VMEM estimate:
    #   2x double-buffered pipeline bufs for (input + 2 outputs) in the I/O dtype
    #   + f32 scratch (padded slab) + ~3 f32 live temporaries (xf, acc, slice).
    per_row_bytes = (L + 2 * pad) * C * (2 * 3 * item + 4 * 4)
    bt = max(1, min(B, vmem_budget_bytes // max(per_row_bytes, 1)))
    grid_b = pl.cdiv(B, bt)

    est_bytes = bt * per_row_bytes
    # Headroom above the estimate, but never request more than is sane on v7x
    # (64 MiB physical VMEM; 32 MiB scoped default on v6e/v7x).
    vmem_limit = int(min(max(est_bytes + est_bytes // 2, 32 * 1024 * 1024),
                         56 * 1024 * 1024))
    # TODO(synk): if a single batch row (L*C) is too large even with bt=1, add an
    # L-tiled variant with `pad`-row halo reads instead of relying on vmem_limit.

    kernel = functools.partial(_series_decomp_kernel,
                               kernel_size=kernel_size, pad=pad)

    res, mean = pl.pallas_call(
        kernel,
        out_shape=(jax.ShapeDtypeStruct((B, L, C), x.dtype),
                   jax.ShapeDtypeStruct((B, L, C), x.dtype)),
        grid_spec=pltpu.PrefetchScalarGridSpec(
            num_scalar_prefetch=0,
            grid=(grid_b,),
            in_specs=[pl.BlockSpec((bt, L, C), lambda i: (i, 0, 0))],
            out_specs=[pl.BlockSpec((bt, L, C), lambda i: (i, 0, 0)),
                       pl.BlockSpec((bt, L, C), lambda i: (i, 0, 0))],
            scratch_shapes=[pltpu.VMEM((bt, L + 2 * pad, C), jnp.float32)],
        ),
        compiler_params=pltpu.CompilerParams(
            dimension_semantics=("parallel",),   # megacore-shard batch tiles on v7x
            vmem_limit_bytes=vmem_limit,
        ),
    )(x)
    return res, mean


def _reference(x, kernel_size):
    """Pure-JAX reference mirroring the PyTorch module."""
    p = (kernel_size - 1) // 2
    xf = x.astype(jnp.float32)
    L = x.shape[1]
    if p > 0:
        front = jnp.repeat(xf[:, :1, :], p, axis=1)
        end = jnp.repeat(xf[:, -1:, :], p, axis=1)
        xp = jnp.concatenate([front, xf, end], axis=1)
    else:
        xp = xf
    windows = jnp.stack([xp[:, j:j + L, :] for j in range(kernel_size)], axis=0)
    mean = jnp.mean(windows, axis=0)
    res = xf - mean
    return res.astype(x.dtype), mean.astype(x.dtype)


if __name__ == "__main__":
    key = jax.random.PRNGKey(0)
    k1, k2 = jax.random.split(key)

    # Config 1: small semantics check (narrow channels, strong edge clamping).
    B, L, C, K = 2, 32, 32, 25
    x = jax.random.normal(k1, (B, L, C), dtype=jnp.float32)
    res, mean = series_decomp(x, K)
    res = jax.block_until_ready(res)
    mean = jax.block_until_ready(mean)
    r_ref, m_ref = _reference(x, K)
    assert res.shape == (B, L, C) and mean.shape == (B, L, C)
    assert jnp.allclose(mean, m_ref, atol=1e-5, rtol=1e-5), "moving_mean mismatch"
    assert jnp.allclose(res, r_ref, atol=1e-5, rtol=1e-5), "residual mismatch"
    assert jnp.allclose(res + mean, x, atol=1e-5, rtol=1e-5), "decomposition not exact"

    # Config 2: lane-dense (C = 128) — exercises unmasked stores / larger tiles.
    B2, L2, C2, K2 = 4, 64, 128, 7
    x2 = jax.random.normal(k2, (B2, L2, C2), dtype=jnp.float32)
    res2, mean2 = series_decomp(x2, K2)
    res2 = jax.block_until_ready(res2)
    mean2 = jax.block_until_ready(mean2)
    r2_ref, m2_ref = _reference(x2, K2)
    assert jnp.allclose(mean2, m2_ref, atol=1e-5, rtol=1e-5), "moving_mean mismatch (lane-dense)"
    assert jnp.allclose(res2, r2_ref, atol=1e-5, rtol=1e-5), "residual mismatch (lane-dense)"

    print("KERNEL_OK")
</pallas_src>

<mosaic_0001>
module attributes {stable_mosaic.version = 11 : i64} {
  func.func @_series_decomp_kernel(%arg0: i32, %arg1: memref<2x32x32xf32, #tpu.memory_space<vmem>>, %arg2: memref<2x32x32xf32, #tpu.memory_space<vmem>>, %arg3: memref<2x32x32xf32, #tpu.memory_space<vmem>>, %arg4: memref<2x56x32xf32, #tpu.memory_space<vmem>>) attributes {dimension_semantics = [#tpu.dimension_semantics<parallel>], iteration_bounds = array<i64: 1>, scalar_prefetch = 0 : i64, scratch_operands = 1 : i64, tpu.core_type = #tpu.core_type<tc>, window_params = [{transform_indices = @transform_0, window_bounds = array<i64: 2, 32, 32>}, {transform_indices = @transform_1, window_bounds = array<i64: 2, 32, 32>}, {transform_indices = @transform_2, window_bounds = array<i64: 2, 32, 32>}]} {
    %c0 = arith.constant 0 : index
    %c0_0 = arith.constant 0 : index
    %c0_1 = arith.constant 0 : index
    %0 = vector.load %arg1[%c0, %c0_0, %c0_1] : memref<2x32x32xf32, #tpu.memory_space<vmem>>, vector<2x32x32xf32>
    %c0_2 = arith.constant 0 : index
    %c12 = arith.constant 12 : index
    %c0_3 = arith.constant 0 : index
    %1 = vector.load %arg4[%c0_2, %c12, %c0_3] : memref<2x56x32xf32, #tpu.memory_space<vmem>>, vector<2x32x32xf32>
    tpu.vector_store %arg4[%c0_2, %c12, %c0_3], %0 {strides = array<i32>} : memref<2x56x32xf32, #tpu.memory_space<vmem>>, vector<2x32x32xf32>,
    %2 = vector.extract_strided_slice %0 {offsets = [0, 0, 0], sizes = [2, 1, 32], strides = [1, 1, 1]} : vector<2x32x32xf32> to vector<2x1x32xf32>
    %3 = vector.shape_cast %2 : vector<2x1x32xf32> to vector<2x1x32xf32>
    %4 = vector.broadcast %3 : vector<2x1x32xf32> to vector<2x12x32xf32>
    %c0_4 = arith.constant 0 : index
    %c0_5 = arith.constant 0 : index
    %c0_6 = arith.constant 0 : index
    %5 = vector.load %arg4[%c0_4, %c0_5, %c0_6] : memref<2x56x32xf32, #tpu.memory_space<vmem>>, vector<2x12x32xf32>
    tpu.vector_store %arg4[%c0_4, %c0_5, %c0_6], %4 {strides = array<i32>} : memref<2x56x32xf32, #tpu.memory_space<vmem>>, vector<2x12x32xf32>,
    %6 = vector.extract_strided_slice %0 {offsets = [0, 31, 0], sizes = [2, 1, 32], strides = [1, 1, 1]} : vector<2x32x32xf32> to vector<2x1x32xf32>
    %7 = vector.shape_cast %6 : vector<2x1x32xf32> to vector<2x1x32xf32>
    %8 = vector.broadcast %7 : vector<2x1x32xf32> to vector<2x12x32xf32>
    %c0_7 = arith.constant 0 : index
    %c44 = arith.constant 44 : index
    %c0_8 = arith.constant 0 : index
    %9 = vector.load %arg4[%c0_7, %c44, %c0_8] : memref<2x56x32xf32, #tpu.memory_space<vmem>>, vector<2x12x32xf32>
    tpu.vector_store %arg4[%c0_7, %c44, %c0_8], %8 {strides = array<i32>} : memref<2x56x32xf32, #tpu.memory_space<vmem>>, vector<2x12x32xf32>,
    %c0_9 = arith.constant 0 : index
    %c0_10 = arith.constant 0 : index
    %c0_11 = arith.constant 0 : index
    %10 = vector.load %arg4[%c0_9, %c0_10, %c0_11] : memref<2x56x32xf32, #tpu.memory_space<vmem>>, vector<2x32x32xf32>
    %c0_12 = arith.constant 0 : index
    %c1 = arith.constant 1 : index
    %c0_13 = arith.constant 0 : index
    %11 = vector.load %arg4[%c0_12, %c1, %c0_13] : memref<2x56x32xf32, #tpu.memory_space<vmem>>, vector<2x32x32xf32>
    %12 = arith.addf %10, %11 : vector<2x32x32xf32>
    %c0_14 = arith.constant 0 : index
    %c2 = arith.constant 2 : index
    %c0_15 = arith.constant 0 : index
    %13 = vector.load %arg4[%c0_14, %c2, %c0_15] : memref<2x56x32xf32, #tpu.memory_space<vmem>>, vector<2x32x32xf32>
    %14 = arith.addf %12, %13 : vector<2x32x32xf32>
    %c0_16 = arith.constant 0 : index
    %c3 = arith.constant 3 : index
    %c0_17 = arith.constant 0 : index
    %15 = vector.load %arg4[%c0_16, %c3, %c0_17] : memref<2x56x32xf32, #tpu.memory_space<vmem>>, vector<2x32x32xf32>
    %16 = arith.addf %14, %15 : vector<2x32x32xf32>
    %c0_18 = arith.constant 0 : index
    %c4 = arith.constant 4 : index
    %c0_19 = arith.constant 0 : index
    %17 = vector.load %arg4[%c0_18, %c4, %c0_19] : memref<2x56x32xf32, #tpu.memory_space<vmem>>, vector<2x32x32xf32>
    %18 = arith.addf %16, %17 : vector<2x32x32xf32>
    %c0_20 = arith.constant 0 : index
    %c5 = arith.constant 5 : index
    %c0_21 = arith.constant 0 : index
    %19 = vector.load %arg4[%c0_20, %c5, %c0_21] : memref<2x56x32xf32, #tpu.memory_space<vmem>>, vector<2x32x32xf32>
    %20 = arith.addf %18, %19 : vector<2x32x32xf32>
    %c0_22 = arith.constant 0 : index
    %c6 = arith.constant 6 : index
    %c0_23 = arith.constant 0 : index
    %21 = vector.load %arg4[%c0_22, %c6, %c0_23] : memref<2x56x32xf32, #tpu.memory_space<vmem>>, vector<2x32x32xf32>
    %22 = arith.addf %20, %21 : vector<2x32x32xf32>
    %c0_24 = arith.constant 0 : index
    %c7 = arith.constant 7 : index
    %c0_25 = arith.constant 0 : index
    %23 = vector.load %arg4[%c0_24, %c7, %c0_25] : memref<2x56x32xf32, #tpu.memory_space<vmem>>, vector<2x32x32xf32>
    %24 = arith.addf %22, %23 : vector<2x32x32xf32>
    %c0_26 = arith.constant 0 : index
    %c8 = arith.constant 8 : index
    %c0_27 = arith.constant 0 : index
    %25 = vector.load %arg4[%c0_26, %c8, %c0_27] : memref<2x56x32xf32, #tpu.memory_space<vmem>>, vector<2x32x32xf32>
    %26 = arith.addf %24, %25 : vector<2x32x32xf32>
    %c0_28 = arith.constant 0 : index
    %c9 = arith.constant 9 : index
    %c0_29 = arith.constant 0 : index
    %27 = vector.load %arg4[%c0_28, %c9, %c0_29] : memref<2x56x32xf32, #tpu.memory_space<vmem>>, vector<2x32x32xf32>
    %28 = arith.addf %26, %27 : vector<2x32x32xf32>
    %c0_30 = arith.constant 0 : index
    %c10 = arith.constant 10 : index
    %c0_31 = arith.constant 0 : index
    %29 = vector.load %arg4[%c0_30, %c10, %c0_31] : memref<2x56x32xf32, #tpu.memory_space<vmem>>, vector<2x32x32xf32>
    %30 = arith.addf %28, %29 : vector<2x32x32xf32>
    %c0_32 = arith.constant 0 : index
    %c11 = arith.constant 11 : index
    %c0_33 = arith.constant 0 : index
    %31 = vector.load %arg4[%c0_32, %c11, %c0_33] : memref<2x56x32xf32, #tpu.memory_space<vmem>>, vector<2x32x32xf32>
    %32 = arith.addf %30, %31 : vector<2x32x32xf32>
    %c0_34 = arith.constant 0 : index
    %c12_35 = arith.constant 12 : index
    %c0_36 = arith.constant 0 : index
    %33 = vector.load %arg4[%c0_34, %c12_35, %c0_36] : memref<2x56x32xf32, #tpu.memory_space<vmem>>, vector<2x32x32xf32>
    %34 = arith.addf %32, %33 : vector<2x32x32xf32>
    %c0_37 = arith.constant 0 : index
    %c13 = arith.constant 13 : index
    %c0_38 = arith.constant 0 : index
    %35 = vector.load %arg4[%c0_37, %c13, %c0_38] : memref<2x56x32xf32, #tpu.memory_space<vmem>>, vector<2x32x32xf32>
    %36 = arith.addf %34, %35 : vector<2x32x32xf32>
    %c0_39 = arith.constant 0 : index
    %c14 = arith.constant 14 : index
    %c0_40 = arith.constant 0 : index
    %37 = vector.load %arg4[%c0_39, %c14, %c0_40] : memref<2x56x32xf32, #tpu.memory_space<vmem>>, vector<2x32x32xf32>
    %38 = arith.addf %36, %37 : vector<2x32x32xf32>
    %c0_41 = arith.constant 0 : index
    %c15 = arith.constant 15 : index
    %c0_42 = arith.constant 0 : index
    %39 = vector.load %arg4[%c0_41, %c15, %c0_42] : memref<2x56x32xf32, #tpu.memory_space<vmem>>, vector<2x32x32xf32>
    %40 = arith.addf %38, %39 : vector<2x32x32xf32>
    %c0_43 = arith.constant 0 : index
    %c16 = arith.constant 16 : index
    %c0_44 = arith.constant 0 : index
    %41 = vector.load %arg4[%c0_43, %c16, %c0_44] : memref<2x56x32xf32, #tpu.memory_space<vmem>>, vector<2x32x32xf32>
    %42 = arith.addf %40, %41 : vector<2x32x32xf32>
    %c0_45 = arith.constant 0 : index
    %c17 = arith.constant 17 : index
    %c0_46 = arith.constant 0 : index
    %43 = vector.load %arg4[%c0_45, %c17, %c0_46] : memref<2x56x32xf32, #tpu.memory_space<vmem>>, vector<2x32x32xf32>
    %44 = arith.addf %42, %43 : vector<2x32x32xf32>
    %c0_47 = arith.constant 0 : index
    %c18 = arith.constant 18 : index
    %c0_48 = arith.constant 0 : index
    %45 = vector.load %arg4[%c0_47, %c18, %c0_48] : memref<2x56x32xf32, #tpu.memory_space<vmem>>, vector<2x32x32xf32>
    %46 = arith.addf %44, %45 : vector<2x32x32xf32>
    %c0_49 = arith.constant 0 : index
    %c19 = arith.constant 19 : index
    %c0_50 = arith.constant 0 : index
    %47 = vector.load %arg4[%c0_49, %c19, %c0_50] : memref<2x56x32xf32, #tpu.memory_space<vmem>>, vector<2x32x32xf32>
    %48 = arith.addf %46, %47 : vector<2x32x32xf32>
    %c0_51 = arith.constant 0 : index
    %c20 = arith.constant 20 : index
    %c0_52 = arith.constant 0 : index
    %49 = vector.load %arg4[%c0_51, %c20, %c0_52] : memref<2x56x32xf32, #tpu.memory_space<vmem>>, vector<2x32x32xf32>
    %50 = arith.addf %48, %49 : vector<2x32x32xf32>
    %c0_53 = arith.constant 0 : index
    %c21 = arith.constant 21 : index
    %c0_54 = arith.constant 0 : index
    %51 = vector.load %arg4[%c0_53, %c21, %c0_54] : memref<2x56x32xf32, #tpu.memory_space<vmem>>, vector<2x32x32xf32>
    %52 = arith.addf %50, %51 : vector<2x32x32xf32>
    %c0_55 = arith.constant 0 : index
    %c22 = arith.constant 22 : index
    %c0_56 = arith.constant 0 : index
    %53 = vector.load %arg4[%c0_55, %c22, %c0_56] : memref<2x56x32xf32, #tpu.memory_space<vmem>>, vector<2x32x32xf32>
    %54 = arith.addf %52, %53 : vector<2x32x32xf32>
    %c0_57 = arith.constant 0 : index
    %c23 = arith.constant 23 : index
    %c0_58 = arith.constant 0 : index
    %55 = vector.load %arg4[%c0_57, %c23, %c0_58] : memref<2x56x32xf32, #tpu.memory_space<vmem>>, vector<2x32x32xf32>
    %56 = arith.addf %54, %55 : vector<2x32x32xf32>
    %c0_59 = arith.constant 0 : index
    %c24 = arith.constant 24 : index
    %c0_60 = arith.constant 0 : index
    %57 = vector.load %arg4[%c0_59, %c24, %c0_60] : memref<2x56x32xf32, #tpu.memory_space<vmem>>, vector<2x32x32xf32>
    %58 = arith.addf %56, %57 : vector<2x32x32xf32>
    %cst = arith.constant 4.000000e-02 : f32
    %59 = vector.broadcast %cst : f32 to vector<2x32x32xf32>
    %60 = arith.mulf %58, %59 : vector<2x32x32xf32>
    %c0_61 = arith.constant 0 : index
    %c0_62 = arith.constant 0 : index
    %c0_63 = arith.constant 0 : index
    %61 = vector.load %arg3[%c0_61, %c0_62, %c0_63] : memref<2x32x32xf32, #tpu.memory_space<vmem>>, vector<2x32x32xf32>
    tpu.vector_store %arg3[%c0_61, %c0_62, %c0_63], %60 {strides = array<i32>} : memref<2x32x32xf32, #tpu.memory_space<vmem>>, vector<2x32x32xf32>,
    %62 = arith.subf %0, %60 : vector<2x32x32xf32>
    %c0_64 = arith.constant 0 : index
    %c0_65 = arith.constant 0 : index
    %c0_66 = arith.constant 0 : index
    %63 = vector.load %arg2[%c0_64, %c0_65, %c0_66] : memref<2x32x32xf32, #tpu.memory_space<vmem>>, vector<2x32x32xf32>
    tpu.vector_store %arg2[%c0_64, %c0_65, %c0_66], %62 {strides = array<i32>} : memref<2x32x32xf32, #tpu.memory_space<vmem>>, vector<2x32x32xf32>,
    return
  }
  func.func @transform_0(%arg0: i32) -> (i32, i32, i32) {
    %c0_i32 = arith.constant 0 : i32
    %c0_i32_0 = arith.constant 0 : i32
    %c0_i32_1 = arith.constant 0 : i32
    return %arg0, %c0_i32, %c0_i32_0 : i32, i32, i32
  }
  func.func @transform_1(%arg0: i32) -> (i32, i32, i32) {
    %c0_i32 = arith.constant 0 : i32
    %c0_i32_0 = arith.constant 0 : i32
    %c0_i32_1 = arith.constant 0 : i32
    return %arg0, %c0_i32, %c0_i32_0 : i32, i32, i32
  }
  func.func @transform_2(%arg0: i32) -> (i32, i32, i32) {
    %c0_i32 = arith.constant 0 : i32
    %c0_i32_0 = arith.constant 0 : i32
    %c0_i32_1 = arith.constant 0 : i32
    return %arg0, %c0_i32, %c0_i32_0 : i32, i32, i32
  }
}

</mosaic_0001>

<bundles_post_ra>
// kernel: tpu_custom_call.1
= control target key start
LH: loop header
LB: loop body
LE: loop exit
PB: predicated region body
PF: predicated region fallthrough
CT: control target
= control target key end

     0   :  { %8 = vsyncpa [#allocation4], 0  ;;  %s778_s0 = inlined_call_operand.hbm [shape: f32[2,32,32], index: 0, kind: input, shape index: {}]   ;;  %s779_s1 = inlined_call_operand.hbm [shape: f32[2,32,32], index: 1, kind: output, shape index: {0}]   ;;  %s780_s2 = inlined_call_operand.hbm [shape: f32[2,32,32], index: 2, kind: output, shape index: {1}]  }
   0x1   :  { %9 = vsyncpa [#allocation5], 0 }
   0x2   :  { %10 = vsyncpa [#allocation8], 0  ;;  %s15_s11 = sshll.u32 %s778_s0, 4  ;;  %s500_s12 = smov [#allocation3]   ;;  %s16_s11 = int_to_ptr.hbm [resolvable:$true] %s15_s11 }
   0x3   :  { %s17_s13 = sshll.u32 %s500_s12, 4  ;;  %s501_s14 = smov 128   ;;  %s18_s13 = int_to_ptr.vmem [resolvable:$true] %s17_s13 }
   0x4   :  { %s502_s15 = smov 8  }
   0x5   :  { %23 = dma.hbm_to_vmem [thread:$0]  %s16_s11, 1024, %s18_s13, [#allocation4], %s501_s14, %s501_s14, %s502_s15  }
   0x6   :  { %494 = dma.done.wait [#allocation4], 1024  }
   0x7   :  { %495 = vsyncadd [#allocation4], 4294966272  ;;  %vm36_vm0 = vcmask 261120   ;;  %v526_v0 = vld [vmem:[#allocation3] sm:$0xff]  ;;  %v528_v1 = vld [vmem:[#allocation3 + $0x8] sm:$0xff]  ;;  %vm48_vm1 = vcmask 257024  }
   0x8   :  { %796 = vst [vmem:[#allocation12_spill] sm:$0xff] %v528_v1  ;;  %v530_v2 = vld [vmem:[#allocation3 + $0x10] sm:$0xff]  ;;  %v534_v3 = vld [vmem:[#allocation3 + $0x20] sm:$0xff]  ;;  %v538_v4 = vld [vmem:[#allocation3 + $0x28] sm:$0xff]  ;;  %v45_v8 = vperm.slane %v526_v0, 0  ;;  %s503_s0 = smov [#allocation7]  }
   0x9   :  { %37 = vst.msk [vmem:[#allocation2 + $0xc] sm:$0xff] %vm36_vm0, %v526_v0  ;;  %v542_v5 = vld [vmem:[#allocation3 + $0x30] sm:$0xff]  ;;  %v546_v6 = vld [vmem:[#allocation3 + $0x18] sm:$0xff]  ;;  %v46_v9 = vperm.slane %v534_v3, 0  ;;  %s397_s16 = sshll.u32 %s503_s0, 4  ;;  %s399_s19 = sshll.u32 %s780_s2, 4  ;;  %s398_s16 = int_to_ptr.vmem [resolvable:$true] %s397_s16  ;;  %s400_s19 = int_to_ptr.hbm [resolvable:$true] %s399_s19 }
   0xa   :  { %797 = vst [vmem:[#allocation13_spill] sm:$0xff] %v534_v3  ;;  %v550_v7 = vld [vmem:[#allocation3 + $0x38] sm:$0xff]  ;;  %v52_v13 = vperm.slane %v546_v6, 7  ;;  %s504_s20 = smov [#allocation6]   ;;  %s386_s24 = sshll.u32 %s779_s1, 4  ;;  %s387_s24 = int_to_ptr.hbm [resolvable:$true] %s386_s24 }
   0xb   :  { %38 = vst.msk [vmem:[#allocation2 + $0x14] sm:$0xff] %vm36_vm0, %v528_v1  ;;  %v53_v17 = vperm.slane %v550_v7, 7  ;;  %s384_s21 = sshll.u32 %s504_s20, 4  ;;  %s385_s21 = int_to_ptr.vmem [resolvable:$true] %s384_s21 }
   0xc   :  { %798 = vst [vmem:[#allocation14_spill] sm:$0xff] %v538_v4 }
   0xd   :  { %39 = vst.msk [vmem:[#allocation2 + $0x1c] sm:$0xff] %vm36_vm0, %v530_v2 }
   0xe   :  { %41 = vst.msk [vmem:[#allocation2 + $0x44] sm:$0xff] %vm36_vm0, %v534_v3 }
   0xf   :  { %42 = vst.msk [vmem:[#allocation2 + $0x4c] sm:$0xff] %vm36_vm0, %v538_v4 }
  0x10   :  { %799 = vst [vmem:[#allocation15_spill] sm:$0xff] %v550_v7 }
  0x11   :  { %43 = vst.msk [vmem:[#allocation2 + $0x54] sm:$0xff] %vm36_vm0, %v542_v5 }
  0x12   :  { %40 = vst.msk [vmem:[#allocation2 + $0x24] sm:$0xff] %vm36_vm0, %v546_v6  ;;  %v560_v10 = vld [vmem:[#allocation2 + $0x10] sm:$0xff] }
  0x13   :  { %44 = vst.msk [vmem:[#allocation2 + $0x5c] sm:$0xff] %vm36_vm0, %v550_v7  ;;  %v562_v11 = vld [vmem:[#allocation2 + $0x11] sm:$0xff] }
  0x14   :  { %v564_v12 = vld [vmem:[#allocation2 + $0x12] sm:$0xff]  ;;  %47 = vst.msk [vmem:[#allocation2] sm:$0xff] %vm36_vm0, %v45_v8  ;;  %v76_v14 = vadd.f32 %v562_v11, %v560_v10  ;;  %v591_v25 = vld [vmem:[#allocation2 + $0x1a] sm:$0xff] }
  0x15   :  { %v570_v15 = vld [vmem:[#allocation2 + $0x18] sm:$0xff]  ;;  %49 = vst.msk [vmem:[#allocation2 + $0x8] sm:$0xf] %vm48_vm1, %v45_v8 }
  0x16   :  { %v573_v16 = vld [vmem:[#allocation2 + $0x19] sm:$0xff]  ;;  %50 = vst.msk [vmem:[#allocation2 + $0x38] sm:$0xff] %vm36_vm0, %v46_v9  ;;  %v92_v18 = vadd.f32 %v564_v12, %v76_v14  ;;  %v583_v21 = vld [vmem:[#allocation2 + $0x48] sm:$0xff] }
  0x17   :  { %v578_v19 = vld [vmem:[#allocation2 + $0x13] sm:$0xff]  ;;  %51 = vst.msk [vmem:[#allocation2 + $0x40] sm:$0xf] %vm48_vm1, %v46_v9  ;;  %v77_v20 = vadd.f32 %v573_v16, %v570_v15  ;;  %v585_v22 = vld [vmem:[#allocation2 + $0x49] sm:$0xff]  ;;  %v611_v37 = vld [vmem:[#allocation2 + $0x1b] sm:$0xff] }
  0x18   :  { %v587_v23 = vld [vmem:[#allocation2 + $0x4a] sm:$0xff]  ;;  %54 = vst.msk [vmem:[#allocation2 + $0x2c] sm:$0xff] %vm36_vm0, %v52_v13  ;;  %v108_v24 = vadd.f32 %v578_v19, %v92_v18  ;;  %v80_v26 = vadd.f32 %v585_v22, %v583_v21  ;;  %v596_v27 = vld [vmem:[#allocation2 + $0x14] sm:$0xff]  ;;  %v637_v14 = vld [vmem:[#allocation2 + $0x1c] sm:$0xff] }
  0x19   :  { %55 = vst.msk [vmem:[#allocation2 + $0x34] sm:$0xf] %vm48_vm1, %v52_v13  ;;  %v600_v29 = vld [vmem:[#allocation2 + $0x15] sm:$0xff]  ;;  %v93_v33 = vadd.f32 %v591_v25, %v77_v20  ;;  %v609_v34 = vld [vmem:[#allocation2 + $0x4b] sm:$0xff]  ;;  %v198_v1 = vld [vmem:[#allocation2 + $0x22] sm:$0xff] }
  0x1a   :  { %56 = vst.msk [vmem:[#allocation2 + $0x64] sm:$0xff] %vm36_vm0, %v53_v17  ;;  %v124_v28 = vadd.f32 %v596_v27, %v108_v24  ;;  %v96_v30 = vadd.f32 %v587_v23, %v80_v26  ;;  %v603_v31 = vld [vmem:[#allocation2 + $0x50] sm:$0xff] }
  0x1b   :  { %v605_v32 = vld [vmem:[#allocation2 + $0x51] sm:$0xff]  ;;  %57 = vst.msk [vmem:[#allocation2 + $0x6c] sm:$0xf] %vm48_vm1, %v53_v17  ;;  %v58_v35 = vld [vmem:[#allocation2] sm:$0xff]  ;;  %v109_v54 = vadd.f32 %v611_v37, %v93_v33 }
  0x1c   :  { %v66_v36 = vld [vmem:[#allocation2 + $0x1] sm:$0xff]  ;;  %800 = vst [vmem:[#allocation16_spill] sm:$0xff] %v611_v37  ;;  %v140_v38 = vadd.f32 %v600_v29, %v124_v28  ;;  %v112_v39 = vadd.f32 %v609_v34, %v96_v30  ;;  %v615_v41 = vld [vmem:[#allocation2 + $0x16] sm:$0xff]  ;;  %v617_v42 = vld [vmem:[#allocation2 + $0x4c] sm:$0xff]  ;;  %v81_v43 = vadd.f32 %v605_v32, %v603_v31 }
  0x1d   :  { %v74_v40 = vadd.f32 %v66_v36, %v58_v35  ;;  %v82_v44 = vld [vmem:[#allocation2 + $0x2] sm:$0xff]  ;;  %v622_v46 = vld [vmem:[#allocation2 + $0x17] sm:$0xff]  ;;  %v627_v51 = vld [vmem:[#allocation2 + $0x4d] sm:$0xff]  ;;  %801 = vst [vmem:[#allocation17_spill] sm:$0xff] %v637_v14  ;;  %v125_v24 = vadd.f32 %v637_v14, %v109_v54 }
  0x1e   :  { %v156_v45 = vadd.f32 %v615_v41, %v140_v38  ;;  %v128_v47 = vadd.f32 %v617_v42, %v112_v39  ;;  %v625_v48 = vld [vmem:[#allocation2 + $0x52] sm:$0xff]  ;;  %v98_v52 = vld [vmem:[#allocation2 + $0x3] sm:$0xff]  ;;  %v86_v62 = vld [vmem:[#allocation2 + $0x3a] sm:$0xff] }
  0x1f   :  { %v90_v49 = vadd.f32 %v82_v44, %v74_v40  ;;  %v62_v50 = vld [vmem:[#allocation2 + $0x38] sm:$0xff]  ;;  %v97_v59 = vadd.f32 %v625_v48, %v81_v43  ;;  %v633_v60 = vld [vmem:[#allocation2 + $0x4e] sm:$0xff]  ;;  %v114_v61 = vld [vmem:[#allocation2 + $0x4] sm:$0xff] }
  0x20   :  { %v70_v53 = vld [vmem:[#allocation2 + $0x39] sm:$0xff]  ;;  %v172_v55 = vadd.f32 %v622_v46, %v156_v45  ;;  %v144_v56 = vadd.f32 %v627_v51, %v128_v47  ;;  %v639_v17 = vld [vmem:[#allocation2 + $0x4f] sm:$0xff]  ;;  %v130_v18 = vld [vmem:[#allocation2 + $0x5] sm:$0xff] }
  0x21   :  { %v106_v57 = vadd.f32 %v98_v52, %v90_v49  ;;  %v78_v58 = vadd.f32 %v70_v53, %v62_v50  ;;  %v102_v20 = vld [vmem:[#allocation2 + $0x3b] sm:$0xff]  ;;  %v643_v28 = vld [vmem:[#allocation2 + $0x53] sm:$0xff]  ;;  %v59_v33 = vld [vmem:[#allocation2 + $0x8] sm:$0xff] }
  0x22   :  { %v182_v63 = vadd.f32 %v172_v55, %v570_v15  ;;  %v160_v8 = vadd.f32 %v633_v60, %v144_v56  ;;  %802 = vst [vmem:[#allocation18_spill] sm:$0xff] %v643_v28  ;;  %v646_v38 = vld [vmem:[#allocation2 + $0x1d] sm:$0xff]  ;;  %v67_v39 = vld [vmem:[#allocation2 + $0x9] sm:$0xff]  ;;  %v113_v45 = vadd.f32 %v643_v28, %v97_v59 }
  0x23   :  { %v122_v9 = vadd.f32 %v114_v61, %v106_v57  ;;  %v94_v13 = vadd.f32 %v86_v62, %v78_v58  ;;  %803 = vst [vmem:[#allocation19_spill] sm:$0xff] %v646_v38  ;;  %v146_v40 = vld [vmem:[#allocation2 + $0x6] sm:$0xff]  ;;  %v118_v43 = vld [vmem:[#allocation2 + $0x3c] sm:$0xff]  ;;  %v141_v44 = vadd.f32 %v646_v38, %v125_v24  ;;  %v660_v24 = vld [vmem:[#allocation2 + $0x54] sm:$0xff] }
  0x24   :  { %v192_v26 = vadd.f32 %v182_v63, %v573_v16  ;;  %v176_v30 = vadd.f32 %v639_v17, %v160_v8  ;;  %v63_v50 = vld [vmem:[#allocation2 + $0x40] sm:$0xff]  ;;  %806 = vst [vmem:[#allocation22_spill] sm:$0xff] %v660_v24  ;;  %v99_v7 = vld [vmem:[#allocation2 + $0xb] sm:$0xff] }
  0x25   :  { %v138_v35 = vadd.f32 %v130_v18, %v122_v9  ;;  %v110_v36 = vadd.f32 %v102_v20, %v94_v13  ;;  %v71_v52 = vld [vmem:[#allocation2 + $0x41] sm:$0xff]  ;;  %v75_v9 = vadd.f32 %v67_v39, %v59_v33 }
  0x26   :  { %v186_v47 = vadd.f32 %v176_v30, %v603_v31  ;;  %v651_v54 = vld [vmem:[#allocation2 + $0x1e] sm:$0xff]  ;;  %v202_v55 = vadd.f32 %v192_v26, %v591_v25  ;;  %v162_v56 = vld [vmem:[#allocation2 + $0x7] sm:$0xff]  ;;  %v79_v13 = vadd.f32 %v71_v52, %v63_v50 }
  0x27   :  { %v154_v49 = vadd.f32 %v146_v40, %v138_v35  ;;  %v126_v53 = vadd.f32 %v118_v43, %v110_v36  ;;  %804 = vst [vmem:[#allocation20_spill] sm:$0xff] %v651_v54  ;;  %v134_v57 = vld [vmem:[#allocation2 + $0x3d] sm:$0xff]  ;;  %v157_v58 = vadd.f32 %v651_v54, %v141_v44  ;;  %v129_v40 = vadd.f32 %v660_v24, %v113_v45 }
  0x28   :  { %v196_v61 = vadd.f32 %v186_v47, %v605_v32  ;;  %v656_v8 = vld [vmem:[#allocation2 + $0x1f] sm:$0xff]  ;;  %v212_v59 = vadd.f32 %v202_v55, %v611_v37  ;;  %v667_v47 = vld [vmem:[#allocation2 + $0x55] sm:$0xff] }
  0x29   :  { %v170_v62 = vadd.f32 %v162_v56, %v154_v49  ;;  %v142_v63 = vadd.f32 %v134_v57, %v126_v53  ;;  %805 = vst [vmem:[#allocation21_spill] sm:$0xff] %v656_v8  ;;  %v150_v18 = vld [vmem:[#allocation2 + $0x3e] sm:$0xff]  ;;  %v173_v20 = vadd.f32 %v656_v8, %v157_v58  ;;  %v83_v53 = vld [vmem:[#allocation2 + $0xa] sm:$0xff]  ;;  %v672_v45 = vld [vmem:[#allocation2 + $0x56] sm:$0xff] }
  0x2a   :  { %v662_v35 = vld [vmem:[#allocation2 + $0x20] sm:$0xff]  ;;  %v222_v36 = vadd.f32 %v212_v59, %v637_v14  ;;  %808 = vst [vmem:[#allocation24_spill] sm:$0xff] %v667_v47  ;;  %v206_v49 = vadd.f32 %v196_v61, %v625_v48 }
  0x2b   :  { %v180_v26 = vadd.f32 %v170_v62, %v59_v33  ;;  %v158_v30 = vadd.f32 %v150_v18, %v142_v63  ;;  %807 = vst [vmem:[#allocation23_spill] sm:$0xff] %v662_v35  ;;  %v166_v43 = vld [vmem:[#allocation2 + $0x3f] sm:$0xff]  ;;  %v183_v44 = vadd.f32 %v662_v35, %v173_v20  ;;  %v145_v62 = vadd.f32 %v667_v47, %v129_v40 }
  0x2c   :  { %v87_v56 = vld [vmem:[#allocation2 + $0x42] sm:$0xff]  ;;  %v232_v33 = vadd.f32 %v222_v36, %v646_v38  ;;  %v91_v63 = vadd.f32 %v83_v53, %v75_v9  ;;  %809 = vst [vmem:[#allocation25_spill] sm:$0xff] %v672_v45  ;;  %v216_v20 = vadd.f32 %v206_v49, %v643_v28 }
  0x2d   :  { %v190_v55 = vadd.f32 %v180_v26, %v67_v39  ;;  %v174_v57 = vadd.f32 %v166_v43, %v158_v30  ;;  %v188_v58 = vld [vmem:[#allocation2 + $0x21] sm:$0xff]  ;;  %v95_v59 = vadd.f32 %v87_v56, %v79_v13  ;;  %v161_v39 = vadd.f32 %v672_v45, %v145_v62  ;;  %v677_v43 = vld [vmem:[#allocation2 + $0x57] sm:$0xff] }
  0x2e   :  { %v193_v18 = vadd.f32 %v188_v58, %v183_v44  ;;  %v242_v61 = vadd.f32 %v232_v33, %v651_v54  ;;  %810 = vst [vmem:[#allocation26_spill] sm:$0xff] %v677_v43  ;;  %v226_v36 = vadd.f32 %v216_v20, %v660_v24  ;;  %v208_v9 = vld [vmem:[#allocation2 + $0x23] sm:$0xff]  ;;  %v107_v33 = vadd.f32 %v99_v7, %v91_v63 }
  0x2f   :  { %v184_v4 = vadd.f32 %v174_v57, %v63_v50  ;;  %v200_v26 = vadd.f32 %v190_v55, %v83_v53  ;;  %v177_v44 = vadd.f32 %v677_v43, %v161_v39  ;;  %v682_v50 = vld [vmem:[#allocation2 + $0x58] sm:$0xff]  ;;  %v103_v53 = vld [vmem:[#allocation2 + $0x43] sm:$0xff] }
  0x30   :  { %v203_v30 = vadd.f32 %v198_v1, %v193_v18  ;;  %v252_v13 = vadd.f32 %v242_v61, %v656_v8  ;;  %v236_v57 = vadd.f32 %v226_v36, %v667_v47  ;;  %v218_v55 = vld [vmem:[#allocation2 + $0x24] sm:$0xff]  ;;  %v189_v8 = vld [vmem:[#allocation2 + $0x59] sm:$0xff] }
  0x31   :  { %v194_v40 = vadd.f32 %v184_v4, %v71_v52  ;;  %v210_v62 = vadd.f32 %v200_v26, %v99_v7  ;;  %v187_v20 = vadd.f32 %v682_v50, %v177_v44  ;;  %v115_v4 = vld [vmem:[#allocation2 + $0xc] sm:$0xff]  ;;  %v111_v52 = vadd.f32 %v103_v53, %v95_v59  ;;  %v119_v24 = vld [vmem:[#allocation2 + $0x44] sm:$0xff] }
  0x32   :  { %v213_v49 = vadd.f32 %v208_v9, %v203_v30  ;;  %v262_v18 = vadd.f32 %v252_v13, %v662_v35  ;;  %v246_v39 = vadd.f32 %v236_v57, %v672_v45  ;;  %v123_v30 = vadd.f32 %v115_v4, %v107_v33  ;;  %v228_v14 = vld [vmem:[#allocation2 + $0x25] sm:$0xff]  ;;  %v131_v7 = vld [vmem:[#allocation2 + $0xd] sm:$0xff]  ;;  %v199_v13 = vld [vmem:[#allocation2 + $0x5a] sm:$0xff] }
  0x33   :  { %v204_v54 = vadd.f32 %v194_v40, %v87_v56  ;;  %v220_v38 = vadd.f32 %v210_v62, %v115_v4  ;;  %v197_v63 = vadd.f32 %v189_v8, %v187_v20  ;;  %v127_v26 = vadd.f32 %v119_v24, %v111_v52  ;;  %v135_v56 = vld [vmem:[#allocation2 + $0x45] sm:$0xff]  ;;  %v147_v57 = vld [vmem:[#allocation2 + $0xe] sm:$0xff]  ;;  %v209_v45 = vld [vmem:[#allocation2 + $0x5b] sm:$0xff] }
  0x34   :  { %v223_v61 = vadd.f32 %v218_v55, %v213_v49  ;;  %v272_v36 = vadd.f32 %v262_v18, %v188_v58  ;;  %v256_v44 = vadd.f32 %v246_v39, %v677_v43  ;;  %v139_v35 = vadd.f32 %v131_v7, %v123_v30  ;;  %v238_v40 = vld [vmem:[#allocation2 + $0x26] sm:$0xff]  ;;  %v163_v39 = vld [vmem:[#allocation2 + $0xf] sm:$0xff]  ;;  %v219_v43 = vld [vmem:[#allocation2 + $0x5c] sm:$0xff] }
  0x35   :  { %v214_v47 = vadd.f32 %v204_v54, %v103_v53  ;;  %v230_v59 = vadd.f32 %v220_v38, %v131_v7  ;;  %v207_v28 = vadd.f32 %v199_v13, %v197_v63  ;;  %v143_v33 = vadd.f32 %v135_v56, %v127_v26  ;;  %v151_v54 = vld [vmem:[#allocation2 + $0x46] sm:$0xff] }
  0x36   :  { %v233_v3 = vadd.f32 %v228_v14, %v223_v61  ;;  %v282_v49 = vadd.f32 %v272_v36, %v198_v1  ;;  %v266_v58 = vadd.f32 %v256_v44, %v682_v50  ;;  %v155_v18 = vadd.f32 %v147_v57, %v139_v35  ;;  %v248_v53 = vld [vmem:[#allocation2 + $0x27] sm:$0xff] }
  0x37   :  { %v224_v62 = vadd.f32 %v214_v47, %v119_v24  ;;  %v240_v20 = vadd.f32 %v230_v59, %v147_v57  ;;  %v217_v61 = vadd.f32 %v209_v45, %v207_v28  ;;  %v159_v30 = vadd.f32 %v151_v54, %v143_v33  ;;  %v167_v26 = vld [vmem:[#allocation2 + $0x47] sm:$0xff]  ;;  %v229_v59 = vld [vmem:[#allocation2 + $0x5d] sm:$0xff] }
  0x38   :  { %v243_v4 = vadd.f32 %v238_v40, %v233_v3  ;;  %v292_v52 = vadd.f32 %v282_v49, %v208_v9  ;;  %v276_v1 = vadd.f32 %v266_v58, %v189_v8  ;;  %v171_v36 = vadd.f32 %v163_v39, %v155_v18  ;;  %v258_v24 = vld [vmem:[#allocation2 + $0x28] sm:$0xff]  ;;  %v239_v58 = vld [vmem:[#allocation2 + $0x5e] sm:$0xff] }
  0x39   :  { %v234_v38 = vadd.f32 %v224_v62, %v135_v56  ;;  %v250_v63 = vadd.f32 %v240_v20, %v163_v39  ;;  %v227_v47 = vadd.f32 %v219_v43, %v217_v61  ;;  %v175_v37 = vadd.f32 %v167_v26, %v159_v30  ;;  %v268_v49 = vld [vmem:[#allocation2 + $0x29] sm:$0xff] }
  0x3a   :  { %v253_v7 = vadd.f32 %v248_v53, %v243_v4  ;;  %v302_v3 = vadd.f32 %v292_v52, %v218_v55  ;;  %v286_v57 = vadd.f32 %v276_v1, %v199_v13  ;;  %v181_v9 = vadd.f32 %v171_v36, %v560_v10 }
  0x3b   :  { %v244_v44 = vadd.f32 %v234_v38, %v151_v54  ;;  %v260_v28 = vadd.f32 %v250_v63, %v560_v10  ;;  %v237_v33 = vadd.f32 %v229_v59, %v227_v47  ;;  %v185_v8 = vadd.f32 %v175_v37, %v583_v21  ;;  %v278_v54 = vld [vmem:[#allocation2 + $0x2a] sm:$0xff]  ;;  %v259_v63 = vld [vmem:[#allocation2 + $0x60] sm:$0xff] }
  0x3c   :  { %v263_v35 = vadd.f32 %v258_v24, %v253_v7  ;;  %v312_v56 = vadd.f32 %v302_v3, %v228_v14  ;;  %v296_v18 = vadd.f32 %v286_v57, %v209_v45  ;;  %v191_v55 = vadd.f32 %v181_v9, %v562_v11  ;;  %v249_v14 = vld [vmem:[#allocation2 + $0x5f] sm:$0xff]  ;;  %v288_v7 = vld [vmem:[#allocation2 + $0x2b] sm:$0xff] }
  0x3d   :  { %v254_v62 = vadd.f32 %v244_v44, %v167_v26  ;;  %v270_v20 = vadd.f32 %v260_v28, %v562_v11  ;;  %v247_v13 = vadd.f32 %v239_v58, %v237_v33  ;;  %v195_v61 = vadd.f32 %v185_v8, %v585_v22  ;;  %v269_v57 = vld [vmem:[#allocation2 + $0x61] sm:$0xff] }
  0x3e   :  { %v273_v4 = vadd.f32 %v268_v49, %v263_v35  ;;  %v322_v52 = vadd.f32 %v312_v56, %v238_v40  ;;  %v306_v30 = vadd.f32 %v296_v18, %v219_v43  ;;  %v201_v37 = vadd.f32 %v191_v55, %v564_v12  ;;  %v298_v43 = vld [vmem:[#allocation2 + $0x2c] sm:$0xff]  ;;  %v279_v8 = vld [vmem:[#allocation2 + $0x62] sm:$0xff] }
  0x3f   :  { %v264_v10 = vadd.f32 %v254_v62, %v583_v21  ;;  %v280_v38 = vadd.f32 %v270_v20, %v564_v12  ;;  %v257_v1 = vadd.f32 %v249_v14, %v247_v13  ;;  %v205_v36 = vadd.f32 %v195_v61, %v587_v23 }
  0x40   :  { %v283_v39 = vadd.f32 %v278_v54, %v273_v4  ;;  %v332_v45 = vadd.f32 %v322_v52, %v248_v53  ;;  %v316_v26 = vadd.f32 %v306_v30, %v229_v59  ;;  %v211_v21 = vadd.f32 %v201_v37, %v578_v19  ;;  %v308_v59 = vld [vmem:[#allocation2 + $0x2d] sm:$0xff]  ;;  %v289_v54 = vld [vmem:[#allocation2 + $0x63] sm:$0xff] }
  0x41   :  { %v274_v11 = vadd.f32 %v264_v10, %v585_v22  ;;  %v290_v3 = vadd.f32 %v280_v38, %v578_v19  ;;  %v267_v44 = vadd.f32 %v259_v63, %v257_v1  ;;  %v215_v12 = vadd.f32 %v205_v36, %v609_v34  ;;  %v328_v10 = vld [vmem:[#allocation2 + $0x2f] sm:$0xff]  ;;  %v299_v37 = vld [vmem:[#allocation2 + $0x64] sm:$0xff] }
  0x42   :  { %v293_v40 = vadd.f32 %v288_v7, %v283_v39  ;;  %v342_v47 = vadd.f32 %v332_v45, %v258_v24  ;;  %v326_v9 = vadd.f32 %v316_v26, %v239_v58  ;;  %v221_v22 = vadd.f32 %v211_v21, %v596_v27  ;;  %v318_v58 = vld [vmem:[#allocation2 + $0x2e] sm:$0xff] }
  0x43   :  { %v284_v35 = vadd.f32 %v274_v11, %v587_v23  ;;  %v300_v28 = vadd.f32 %v290_v3, %v596_v27  ;;  %v277_v56 = vadd.f32 %v269_v57, %v267_v44  ;;  %v225_v19 = vadd.f32 %v215_v12, %v617_v42  ;;  %v338_v7 = vld [vmem:[#allocation2 + $0x30] sm:$0xff] }
  0x44   :  { %v303_v53 = vadd.f32 %v298_v43, %v293_v40  ;;  %v350_v49 = vmul.f32 0.04, %v342_v47  ;;  %v336_v62 = vadd.f32 %v326_v9, %v249_v14  ;;  %v231_v4 = vadd.f32 %v221_v22, %v600_v29  ;;  %v319_v47 = vld [vmem:[#allocation2 + $0x66] sm:$0xff]  ;;  %v811_v22 = vld [vmem:[#allocation16_spill] sm:$0xff] }
  0x45   :  { %v294_v33 = vadd.f32 %v284_v35, %v609_v34  ;;  %v310_v23 = vadd.f32 %v300_v28, %v600_v29  ;;  %v287_v18 = vadd.f32 %v279_v8, %v277_v56  ;;  %v235_v55 = vadd.f32 %v225_v19, %v627_v51  ;;  %v339_v28 = vld [vmem:[#allocation2 + $0x68] sm:$0xff]  ;;  %v814_v56 = vld [vmem:[#allocation17_spill] sm:$0xff]  ;;  %v815_v19 = vld [vmem:[#allocation22_spill] sm:$0xff] }
  0x46   :  { %v313_v24 = vadd.f32 %v308_v59, %v303_v53  ;;  %358 = vst.msk [vmem:[#allocation7 + $0x10] sm:$0xff] %vm36_vm0, %v350_v49  ;;  %v366_v20 = vsub.f32 %v530_v2, %v350_v49  ;;  %v346_v52 = vadd.f32 %v336_v62, %v259_v63  ;;  %v241_v61 = vadd.f32 %v231_v4, %v615_v41  ;;  %v812_v49 = vld [vmem:[#allocation18_spill] sm:$0xff]  ;;  %v813_v59 = vld [vmem:[#allocation13_spill] sm:$0xff]  ;;  %v817_v62 = vld [vmem:[#allocation24_spill] sm:$0xff] }
  0x47   :  { %v304_v27 = vadd.f32 %v294_v33, %v617_v42  ;;  %v320_v13 = vadd.f32 %v310_v23, %v615_v41  ;;  %v297_v39 = vadd.f32 %v289_v54, %v287_v18  ;;  %v245_v14 = vadd.f32 %v235_v55, %v633_v60  ;;  %v818_v4 = vld [vmem:[#allocation15_spill] sm:$0xff]  ;;  %v819_v18 = vld [vmem:[#allocation20_spill] sm:$0xff]  ;;  %v820_v55 = vld [vmem:[#allocation25_spill] sm:$0xff] }
  0x48   :  { %v323_v34 = vadd.f32 %v318_v58, %v313_v24  ;;  %374 = vst.msk [vmem:[#allocation6 + $0x10] sm:$0xff] %vm36_vm0, %v366_v20  ;;  %v354_v30 = vmul.f32 0.04, %v346_v52  ;;  %v251_v38 = vadd.f32 %v241_v61, %v622_v46  ;;  %v822_v52 = vld [vmem:[#allocation26_spill] sm:$0xff]  ;;  %v823_v61 = vld [vmem:[#allocation23_spill] sm:$0xff] }
  0x49   :  { %v314_v29 = vadd.f32 %v304_v27, %v627_v51  ;;  %v330_v2 = vadd.f32 %v320_v13, %v622_v46  ;;  %v307_v45 = vadd.f32 %v299_v37, %v297_v39  ;;  %v255_v41 = vadd.f32 %v245_v14, %v639_v17  ;;  %v309_v51 = vld [vmem:[#allocation2 + $0x65] sm:$0xff] }
  0x4a   :  { %v333_v42 = vadd.f32 %v328_v10, %v323_v34  ;;  %362 = vst.msk [vmem:[#allocation7 + $0x30] sm:$0xff] %vm36_vm0, %v354_v30  ;;  %v261_v40 = vadd.f32 %v251_v38, %v570_v15  ;;  %v370_v63 = vsub.f32 %v542_v5, %v354_v30  ;;  %v329_v5 = vld [vmem:[#allocation2 + $0x67] sm:$0xff]  ;;  %v821_v34 = vld [vmem:[#allocation21_spill] sm:$0xff] }
  0x4b   :  { %v324_v1 = vadd.f32 %v314_v29, %v633_v60  ;;  %v340_v11 = vadd.f32 %v330_v2, %v570_v15  ;;  %v317_v26 = vadd.f32 %v309_v51, %v307_v45  ;;  %v265_v46 = vadd.f32 %v255_v41, %v603_v31  ;;  %v825_v37 = vld [vmem:[#allocation14_spill] sm:$0xff] }
  0x4c   :  { %v343_v36 = vadd.f32 %v338_v7, %v333_v42  ;;  %v271_v43 = vadd.f32 %v261_v40, %v573_v16  ;;  %378 = vst.msk [vmem:[#allocation6 + $0x30] sm:$0xff] %vm36_vm0, %v370_v63  ;;  %v824_v42 = vld [vmem:[#allocation12_spill] sm:$0xff] }
  0x4d   :  { %v334_v3 = vadd.f32 %v324_v1, %v639_v17  ;;  %v348_v60 = vmul.f32 0.04, %v340_v11  ;;  %v327_v44 = vadd.f32 %v319_v47, %v317_v26  ;;  %v275_v12 = vadd.f32 %v265_v46, %v605_v32 }
  0x4e   :  { %v351_v21 = vmul.f32 0.04, %v343_v36  ;;  %v281_v15 = vadd.f32 %v271_v43, %v591_v25 }
  0x4f   :  { %v344_v35 = vadd.f32 %v334_v3, %v603_v31  ;;  %v364_v53 = vsub.f32 %v526_v0, %v348_v60  ;;  %v337_v57 = vadd.f32 %v329_v5, %v327_v44  ;;  %356 = vst.msk [vmem:[#allocation7] sm:$0xff] %vm36_vm0, %v348_v60  ;;  %v285_v9 = vadd.f32 %v275_v12, %v625_v48  ;;  %v816_v48 = vld [vmem:[#allocation19_spill] sm:$0xff] }
  0x50   :  { %359 = vst.msk [vmem:[#allocation7 + $0x18] sm:$0xff] %vm36_vm0, %v351_v21  ;;  %v367_v17 = vsub.f32 %v546_v6, %v351_v21  ;;  %v291_v31 = vadd.f32 %v281_v15, %v811_v22 }
  0x51   :  { %v352_v16 = vmul.f32 0.04, %v344_v35  ;;  %v347_v32 = vadd.f32 %v339_v28, %v337_v57  ;;  %v295_v25 = vadd.f32 %v285_v9, %v812_v49  ;;  %372 = vst.msk [vmem:[#allocation6] sm:$0xff] %vm36_vm0, %v364_v53 }
  0x52   :  { %375 = vst.msk [vmem:[#allocation6 + $0x18] sm:$0xff] %vm36_vm0, %v367_v17  ;;  %v301_v0 = vadd.f32 %v291_v31, %v814_v56 }
  0x53   :  { %360 = vst.msk [vmem:[#allocation7 + $0x20] sm:$0xff] %vm36_vm0, %v352_v16  ;;  %v368_v6 = vsub.f32 %v813_v59, %v352_v16  ;;  %v355_v33 = vmul.f32 0.04, %v347_v32  ;;  %v305_v24 = vadd.f32 %v295_v25, %v815_v19 }
  0x54   :  { %v311_v8 = vadd.f32 %v301_v0, %v816_v48 }
  0x55   :  { %376 = vst.msk [vmem:[#allocation6 + $0x20] sm:$0xff] %vm36_vm0, %v368_v6  ;;  %v315_v23 = vadd.f32 %v305_v24, %v817_v62  ;;  %v371_v58 = vsub.f32 %v818_v4, %v355_v33 }
  0x56   :  { %363 = vst.msk [vmem:[#allocation7 + $0x38] sm:$0xff] %vm36_vm0, %v355_v33  ;;  %v321_v27 = vadd.f32 %v311_v8, %v819_v18 }
  0x57   :  { %v325_v20 = vadd.f32 %v315_v23, %v820_v55  ;;  %379 = vst.msk [vmem:[#allocation6 + $0x38] sm:$0xff] %vm36_vm0, %v371_v58 }
  0x58   :  { %v331_v54 = vadd.f32 %v321_v27, %v821_v34 }
  0x59   :  { %v335_v13 = vadd.f32 %v325_v20, %v822_v52 }
  0x5a   :  { %v341_v10 = vadd.f32 %v331_v54, %v823_v61 }
  0x5b   :  { %v345_v39 = vadd.f32 %v335_v13, %v682_v50 }
  0x5c   :  { %v349_v29 = vmul.f32 0.04, %v341_v10 }
  0x5d   :  { %v353_v14 = vmul.f32 0.04, %v345_v39 }
  0x5e   :  { %357 = vst.msk [vmem:[#allocation7 + $0x8] sm:$0xff] %vm36_vm0, %v349_v29  ;;  %v365_v30 = vsub.f32 %v824_v42, %v349_v29 }
  0x5f   :  { %361 = vst.msk [vmem:[#allocation7 + $0x28] sm:$0xff] %vm36_vm0, %v353_v14  ;;  %v369_v2 = vsub.f32 %v825_v37, %v353_v14 }
  0x60   :  { %373 = vst.msk [vmem:[#allocation6 + $0x8] sm:$0xff] %vm36_vm0, %v365_v30  ;;  %405 = dma.vmem_to_hbm [thread:$0]  %s398_s16, 1024, %s400_s19, [#allocation8], %s501_s14, %s501_s14, %s502_s15  }
  0x61   :  { %377 = vst.msk [vmem:[#allocation6 + $0x28] sm:$0xff] %vm36_vm0, %v369_v2 }
  0x62   :  { %392 = dma.vmem_to_hbm [thread:$0]  %s385_s21, 1024, %s387_s24, [#allocation5], %s501_s14, %s501_s14, %s502_s15  }
  0x63   :  { %496 = dma.done.wait [#allocation5], 1024  }
  0x64   :  { %497 = vsyncadd [#allocation5], 4294966272 }
  0x65   :  { %498 = dma.done.wait [#allocation8], 1024  }
  0x66   :  { %499 = vsyncadd [#allocation8], 4294966272 }
  0x67   :  { %414 = vsyncpa [#allocation4], 1 }
  0x68   :  { %415 = vsyncpa [#allocation5], 1 }
  0x69   :  { %416 = vsyncpa [#allocation8], 1 }

</bundles_post_ra>
